<compile_context>
chip_gen: v6e
topology: v6e:2x2x1
jax: 0.10.0
libtpu: 0.0.40
codegen_flags: <defaults>
</compile_context>

<pallas_src>
import functools

import jax
import jax.numpy as jnp
from jax.experimental import pallas as pl
from jax.experimental.pallas import tpu as pltpu

_LANE = 128


def _iou_partial_kernel(pred_ref, tgt_ref, inter_ref, psum_ref, tsum_ref, *,
                        rows, row_tile, tiles_per_split, apply_sigmoid,
                        need_row_mask):
    """Accumulate per-sample partial sums over lane-dense (N, R_TILE, 128) tiles.

    pred_ref / tgt_ref        : (N, R_TILE, 128) input tiles of the current chunk.
    inter_ref/psum_ref/tsum_ref: (1, N, 8, 128) f32 output blocks that act as
        carried accumulators (same block index for every reduction step k).
    """
    i = pl.program_id(0)          # parallel split (megacore on v7x)
    k = pl.program_id(1)          # reduction step within the split

    @pl.when(k == 0)
    def _():
        inter_ref[...] = jnp.zeros_like(inter_ref)
        psum_ref[...] = jnp.zeros_like(psum_ref)
        tsum_ref[...] = jnp.zeros_like(tsum_ref)

    p = pred_ref[...].astype(jnp.float32)
    if apply_sigmoid:
        p = jax.nn.sigmoid(p)                 # use_sigmoid=True, activate=True
    t = tgt_ref[...].astype(jnp.float32)      # cast in-kernel (narrow HBM dtype ok)

    if need_row_mask:
        # Zero rows past the valid range: ragged last tile, or duplicated
        # (clamped) tiles when the parallel split does not divide evenly.
        row0 = (i * tiles_per_split + k) * row_tile
        rid = row0 + jax.lax.broadcasted_iota(jnp.int32, p.shape, 1)
        valid = rid < rows
        p = jnp.where(valid, p, 0.0)
        t = jnp.where(valid, t, 0.0)

    n, rt, lanes = p.shape
    g = rt // 8
    # Fold sublanes 8-at-a-time: pure VPU vreg adds, no per-step XLU reduce.
    p4 = p.reshape(n, g, 8, lanes)
    t4 = t.reshape(n, g, 8, lanes)
    inter_ref[...] += jnp.sum(jnp.abs(p4 * t4), axis=1)[None]
    psum_ref[...] += jnp.sum(p4, axis=1)[None]
    tsum_ref[...] += jnp.sum(t4, axis=1)[None]


def _sublane_pack(dtype):
    # Native sublane packing: f32 -> 8, bf16/f16 -> 16, int8/fp8 -> 32.
    return max(8, 32 // jnp.dtype(dtype).itemsize)


def _pick_row_tile(n, rows, itemsizes, sub_mult, budget_bytes=12 << 20):
    """Rows per tile (multiple of the dtype sublane packing) such that the two
    double-buffered input tiles stay within `budget_bytes` of VMEM."""
    per_row = 2 * n * _LANE * sum(itemsizes)          # 2 pipeline buffers each
    fit = (budget_bytes // max(per_row, 1)) // sub_mult * sub_mult
    rows_up = -(-rows // sub_mult) * sub_mult
    return int(max(sub_mult, min(max(fit, sub_mult), 1024, rows_up)))


def iou_loss_forward(pred, target, *, weight=None, eps=1e-7, loss_weight=1.0,
                     ignore_index=255, reduction="mean", avg_factor=None,
                     activate=True, use_sigmoid=True, row_tile=None,
                     input_vmem_budget_bytes=12 << 20):
    """Matches IoULoss(...).forward for same-shape pred/target.

    pred, target: (N, C, H, W).  Returns a scalar for reduction in
    {"mean", "sum"} and an (N,) vector for reduction == "none".
    """
    # TODO(synk): _expand_onehot_labels_dice (pred.shape != target.shape) is
    # not implemented; same-shape inputs are required.
    assert pred.shape == target.shape, "pred/target must have the same shape"
    n, c = pred.shape[0], pred.shape[1]

    apply_sigmoid = bool(activate and use_sigmoid)
    if activate and not use_sigmoid and c != 1:
        # TODO(synk): the softmax (use_sigmoid=False) activation runs in the
        # wrapper (one extra HBM pass); it is not fused into the kernel.
        pred = jax.nn.softmax(pred.astype(jnp.float32), axis=1)

    pred_flat = pred.reshape(n, -1)
    tgt_flat = target.reshape(n, -1)          # keep original (possibly narrow) dtype
    d = pred_flat.shape[1]
    r = d // _LANE                            # full 128-lane rows
    d_tail = d - r * _LANE                    # <128-element column tail

    inter = jnp.zeros((n,), jnp.float32)
    sum_p = jnp.zeros((n,), jnp.float32)
    sum_t = jnp.zeros((n,), jnp.float32)

    if r > 0:
        sub_mult = max(_sublane_pack(pred_flat.dtype), _sublane_pack(tgt_flat.dtype))
        if row_tile is None:
            rt = _pick_row_tile(
                n, r, (pred_flat.dtype.itemsize, tgt_flat.dtype.itemsize),
                sub_mult, input_vmem_budget_bytes)
        else:
            rt = int(max(sub_mult, -(-row_tile // sub_mult) * sub_mult))

        total_tiles = -(-r // rt)
        n_split = 2 if total_tiles >= 2 else 1    # feed both v7x TensorCores
        num_k = -(-total_tiles // n_split)
        need_row_mask = (r % rt != 0) or (n_split * num_k != total_tiles)

        d_main = r * _LANE
        # When d % 128 == 0 the slice below is a no-op; only ragged D pays one
        # relayout pass here (still strictly cheaper than the old jnp.pad).
        pred3 = pred_flat[:, :d_main].reshape(n, r, _LANE)
        tgt3 = tgt_flat[:, :d_main].reshape(n, r, _LANE)

        def in_map(i, k):
            b = i * num_k + k
            return (0, jnp.minimum(b, total_tiles - 1), 0)

        def out_map(i, k):
            return (i, 0, 0, 0)

        kernel = functools.partial(
            _iou_partial_kernel, rows=r, row_tile=rt, tiles_per_split=num_k,
            apply_sigmoid=apply_sigmoid, need_row_mask=need_row_mask)

        acc = jax.ShapeDtypeStruct((n_split, n, 8, _LANE), jnp.float32)
        inter_p, psum_p, tsum_p = pl.pallas_call(
            kernel,
            out_shape=(acc, acc, acc),
            grid_spec=pltpu.PrefetchScalarGridSpec(
                num_scalar_prefetch=0,
                grid=(n_split, num_k),
                in_specs=[pl.BlockSpec((n, rt, _LANE), in_map),
                          pl.BlockSpec((n, rt, _LANE), in_map)],
                out_specs=[pl.BlockSpec((1, n, 8, _LANE), out_map)] * 3,
            ),
            compiler_params=pltpu.CompilerParams(
                dimension_semantics=("parallel", "arbitrary"),
                vmem_limit_bytes=32 * 1024 * 1024),
        )(pred3, tgt3)

        inter = inter + jnp.sum(inter_p, axis=(0, 2, 3))
        sum_p = sum_p + jnp.sum(psum_p, axis=(0, 2, 3))
        sum_t = sum_t + jnp.sum(tsum_p, axis=(0, 2, 3))

    if d_tail > 0:
        # Tiny (<128 per sample) column tail in plain JAX.
        p_tail = pred_flat[:, r * _LANE:].astype(jnp.float32)
        t_tail = tgt_flat[:, r * _LANE:].astype(jnp.float32)
        if apply_sigmoid:
            p_tail = jax.nn.sigmoid(p_tail)
        inter = inter + jnp.sum(jnp.abs(p_tail * t_tail), axis=1)
        sum_p = sum_p + jnp.sum(p_tail, axis=1)
        sum_t = sum_t + jnp.sum(t_tail, axis=1)

    if ignore_index is not None and 0 <= ignore_index < c:
        assert c > 1, "cannot ignore the only channel"
        # Subtract the ignored channel's contribution (reads only N*H*W
        # elements) instead of gathering/copying both full tensors.
        p_ig = pred[:, ignore_index].reshape(n, -1).astype(jnp.float32)
        t_ig = target[:, ignore_index].reshape(n, -1).astype(jnp.float32)
        if apply_sigmoid:
            p_ig = jax.nn.sigmoid(p_ig)
        inter = inter - jnp.sum(jnp.abs(p_ig * t_ig), axis=1)
        sum_p = sum_p - jnp.sum(p_ig, axis=1)
        sum_t = sum_t - jnp.sum(t_ig, axis=1)

    union = sum_p + sum_t - inter
    loss = 1.0 - (inter + eps) / (union + eps)        # (N,) per-sample losses

    # weight_reduce_loss (tiny (N,)-sized epilogue, plain JAX).
    if weight is not None:
        loss = loss * weight.astype(loss.dtype)
    if avg_factor is None:
        if reduction == "mean":
            loss = jnp.mean(loss)
        elif reduction == "sum":
            loss = jnp.sum(loss)
        elif reduction != "none":
            raise ValueError(f"unknown reduction {reduction!r}")
    else:
        if reduction == "mean":
            loss = jnp.sum(loss) / (avg_factor + jnp.finfo(jnp.float32).eps)
        elif reduction != "none":
            raise ValueError('avg_factor can not be used with reduction="sum"')
    return loss_weight * loss


if __name__ == "__main__":
    key = jax.random.PRNGKey(0)
    ks = jax.random.split(key, 6)

    def reference(pred, target, weight=None, eps=1e-7, loss_weight=1.0,
                  ignore_index=255, reduction="mean", avg_factor=None,
                  activate=True, use_sigmoid=True):
        # Pure-JAX mirror of the PyTorch IoULoss.forward.
        pred = pred.astype(jnp.float32)
        target = target.astype(jnp.float32)
        if activate:
            if use_sigmoid:
                pred = jax.nn.sigmoid(pred)
            elif pred.shape[1] != 1:
                pred = jax.nn.softmax(pred, axis=1)
        if ignore_index is not None and 0 <= ignore_index < pred.shape[1]:
            keep = jnp.asarray(
                [i for i in range(pred.shape[1]) if i != ignore_index])
            pred = pred[:, keep]
            target = target[:, keep]
        nn = pred.shape[0]
        p = pred.reshape(nn, -1)
        t = target.reshape(nn, -1)
        inter = jnp.sum(jnp.abs(p * t), axis=1)
        union = jnp.sum(p, axis=1) + jnp.sum(t, axis=1) - inter
        loss = 1.0 - (inter + eps) / (union + eps)
        if weight is not None:
            loss = loss * weight
        if avg_factor is None:
            if reduction == "mean":
                loss = jnp.mean(loss)
            elif reduction == "sum":
                loss = jnp.sum(loss)
        else:
            if reduction == "mean":
                loss = jnp.sum(loss) / (avg_factor + jnp.finfo(jnp.float32).eps)
        return loss_weight * loss

    def check(name, got, want, atol=1e-5, rtol=1e-5):
        got = jax.block_until_ready(got)
        assert jnp.allclose(got, want, atol=atol, rtol=rtol), (name, got, want)

    # Case 1: aligned D (= 4*16*16 = 1024), default config (ignore_index=255).
    N, C, H, W = 2, 4, 16, 16
    pred = jax.random.normal(ks[0], (N, C, H, W), dtype=jnp.float32)
    target = (jax.random.uniform(ks[1], (N, C, H, W)) > 0.5).astype(jnp.float32)
    check("aligned", iou_loss_forward(pred, target), reference(pred, target))

    # Case 2: ragged D (3*29*23 = 2001 -> 15 rows + 81-col tail), bf16 target.
    N2, C2, H2, W2 = 2, 3, 29, 23
    pred_b = jax.random.normal(ks[2], (N2, C2, H2, W2), dtype=jnp.float32)
    target_b = (jax.random.uniform(ks[3], (N2, C2, H2, W2)) > 0.5).astype(jnp.bfloat16)
    check("ragged+bf16", iou_loss_forward(pred_b, target_b),
          reference(pred_b, target_b))

    # Case 3: forced small row tile -> parallel split with clamped tail tile,
    # plus per-sample weights.
    N3, C3, H3, W3 = 2, 5, 32, 32        # D = 5120 -> 40 rows -> 5 tiles of 8
    pred_c = jax.random.normal(ks[4], (N3, C3, H3, W3), dtype=jnp.float32)
    target_c = (jax.random.uniform(ks[5], (N3, C3, H3, W3)) > 0.5).astype(jnp.float32)
    w = jnp.asarray([0.25, 1.75], dtype=jnp.float32)
    check("split+weight",
          iou_loss_forward(pred_c, target_c, weight=w, row_tile=8),
          reference(pred_c, target_c, weight=w))

    # Case 4: ignore_index inside [0, C) -> channel-subtract path.
    check("ignore_index",
          iou_loss_forward(pred, target, ignore_index=2),
          reference(pred, target, ignore_index=2))

    print("KERNEL_OK")
</pallas_src>

<mosaic_0001>
module attributes {stable_mosaic.version = 11 : i64} {
  func.func @_iou_partial_kernel(%arg0: i32, %arg1: i32, %arg2: memref<2x8x128xf32, #tpu.memory_space<vmem>>, %arg3: memref<2x8x128xf32, #tpu.memory_space<vmem>>, %arg4: memref<1x2x8x128xf32, #tpu.memory_space<vmem>>, %arg5: memref<1x2x8x128xf32, #tpu.memory_space<vmem>>, %arg6: memref<1x2x8x128xf32, #tpu.memory_space<vmem>>) attributes {dimension_semantics = [#tpu.dimension_semantics<parallel>, #tpu.dimension_semantics<arbitrary>], iteration_bounds = array<i64: 1, 1>, scalar_prefetch = 0 : i64, scratch_operands = 0 : i64, tpu.core_type = #tpu.core_type<tc>, window_params = [{transform_indices = @transform_0, window_bounds = array<i64: 2, 8, 128>}, {transform_indices = @transform_1, window_bounds = array<i64: 2, 8, 128>}, {transform_indices = @transform_2, window_bounds = array<i64: 1, 2, 8, 128>}, {transform_indices = @transform_3, window_bounds = array<i64: 1, 2, 8, 128>}, {transform_indices = @transform_4, window_bounds = array<i64: 1, 2, 8, 128>}]} {
    %c0_i32 = arith.constant 0 : i32
    %0 = arith.cmpi eq, %arg1, %c0_i32 : i32
    %1 = arith.extui %0 : i1 to i32
    %c0_i32_0 = arith.constant 0 : i32
    %2 = arith.cmpi ne, %1, %c0_i32_0 : i32
    scf.if %2 {
      %cst_33 = arith.constant 0.000000e+00 : f32
      %29 = vector.broadcast %cst_33 : f32 to vector<1x2x8x128xf32>
      %c0_34 = arith.constant 0 : index
      %c0_35 = arith.constant 0 : index
      %c0_36 = arith.constant 0 : index
      %c0_37 = arith.constant 0 : index
      %30 = vector.load %arg4[%c0_34, %c0_35, %c0_36, %c0_37] : memref<1x2x8x128xf32, #tpu.memory_space<vmem>>, vector<1x2x8x128xf32>
      tpu.vector_store %arg4[%c0_34, %c0_35, %c0_36, %c0_37], %29 {strides = array<i32>} : memref<1x2x8x128xf32, #tpu.memory_space<vmem>>, vector<1x2x8x128xf32>,
      %cst_38 = arith.constant 0.000000e+00 : f32
      %31 = vector.broadcast %cst_38 : f32 to vector<1x2x8x128xf32>
      %c0_39 = arith.constant 0 : index
      %c0_40 = arith.constant 0 : index
      %c0_41 = arith.constant 0 : index
      %c0_42 = arith.constant 0 : index
      %32 = vector.load %arg5[%c0_39, %c0_40, %c0_41, %c0_42] : memref<1x2x8x128xf32, #tpu.memory_space<vmem>>, vector<1x2x8x128xf32>
      tpu.vector_store %arg5[%c0_39, %c0_40, %c0_41, %c0_42], %31 {strides = array<i32>} : memref<1x2x8x128xf32, #tpu.memory_space<vmem>>, vector<1x2x8x128xf32>,
      %cst_43 = arith.constant 0.000000e+00 : f32
      %33 = vector.broadcast %cst_43 : f32 to vector<1x2x8x128xf32>
      %c0_44 = arith.constant 0 : index
      %c0_45 = arith.constant 0 : index
      %c0_46 = arith.constant 0 : index
      %c0_47 = arith.constant 0 : index
      %34 = vector.load %arg6[%c0_44, %c0_45, %c0_46, %c0_47] : memref<1x2x8x128xf32, #tpu.memory_space<vmem>>, vector<1x2x8x128xf32>
      tpu.vector_store %arg6[%c0_44, %c0_45, %c0_46, %c0_47], %33 {strides = array<i32>} : memref<1x2x8x128xf32, #tpu.memory_space<vmem>>, vector<1x2x8x128xf32>,
    } else {
    }
    %c0 = arith.constant 0 : index
    %c0_1 = arith.constant 0 : index
    %c0_2 = arith.constant 0 : index
    %3 = vector.load %arg2[%c0, %c0_1, %c0_2] : memref<2x8x128xf32, #tpu.memory_space<vmem>>, vector<2x8x128xf32>
    %4 = arith.negf %3 : vector<2x8x128xf32>
    %5 = math.exp %4 : vector<2x8x128xf32>
    %cst = arith.constant 1.000000e+00 : f32
    %6 = vector.broadcast %cst : f32 to vector<2x8x128xf32>
    %7 = arith.addf %6, %5 : vector<2x8x128xf32>
    %8 = arith.divf %6, %7 : vector<2x8x128xf32>
    %c0_3 = arith.constant 0 : index
    %c0_4 = arith.constant 0 : index
    %c0_5 = arith.constant 0 : index
    %9 = vector.load %arg3[%c0_3, %c0_4, %c0_5] : memref<2x8x128xf32, #tpu.memory_space<vmem>>, vector<2x8x128xf32>
    %10 = vector.shape_cast %8 : vector<2x8x128xf32> to vector<2x1x8x128xf32>
    %11 = vector.shape_cast %9 : vector<2x8x128xf32> to vector<2x1x8x128xf32>
    %c0_6 = arith.constant 0 : index
    %c0_7 = arith.constant 0 : index
    %c0_8 = arith.constant 0 : index
    %c0_9 = arith.constant 0 : index
    %12 = vector.load %arg4[%c0_6, %c0_7, %c0_8, %c0_9] : memref<1x2x8x128xf32, #tpu.memory_space<vmem>>, vector<1x2x8x128xf32>
    %13 = arith.mulf %10, %11 : vector<2x1x8x128xf32>
    %14 = math.absf %13 : vector<2x1x8x128xf32>
    %cst_10 = arith.constant dense<0.000000e+00> : vector<2x8x128xf32>
    %15 = vector.multi_reduction <add>, %14, %cst_10 [1] : vector<2x1x8x128xf32> to vector<2x8x128xf32>
    %16 = vector.shape_cast %15 : vector<2x8x128xf32> to vector<1x2x8x128xf32>
    %17 = arith.addf %12, %16 : vector<1x2x8x128xf32>
    %c0_11 = arith.constant 0 : index
    %c0_12 = arith.constant 0 : index
    %c0_13 = arith.constant 0 : index
    %c0_14 = arith.constant 0 : index
    %18 = vector.load %arg4[%c0_11, %c0_12, %c0_13, %c0_14] : memref<1x2x8x128xf32, #tpu.memory_space<vmem>>, vector<1x2x8x128xf32>
    tpu.vector_store %arg4[%c0_11, %c0_12, %c0_13, %c0_14], %17 {strides = array<i32>} : memref<1x2x8x128xf32, #tpu.memory_space<vmem>>, vector<1x2x8x128xf32>,
    %c0_15 = arith.constant 0 : index
    %c0_16 = arith.constant 0 : index
    %c0_17 = arith.constant 0 : index
    %c0_18 = arith.constant 0 : index
    %19 = vector.load %arg5[%c0_15, %c0_16, %c0_17, %c0_18] : memref<1x2x8x128xf32, #tpu.memory_space<vmem>>, vector<1x2x8x128xf32>
    %cst_19 = arith.constant dense<0.000000e+00> : vector<2x8x128xf32>
    %20 = vector.multi_reduction <add>, %10, %cst_19 [1] : vector<2x1x8x128xf32> to vector<2x8x128xf32>
    %21 = vector.shape_cast %20 : vector<2x8x128xf32> to vector<1x2x8x128xf32>
    %22 = arith.addf %19, %21 : vector<1x2x8x128xf32>
    %c0_20 = arith.constant 0 : index
    %c0_21 = arith.constant 0 : index
    %c0_22 = arith.constant 0 : index
    %c0_23 = arith.constant 0 : index
    %23 = vector.load %arg5[%c0_20, %c0_21, %c0_22, %c0_23] : memref<1x2x8x128xf32, #tpu.memory_space<vmem>>, vector<1x2x8x128xf32>
    tpu.vector_store %arg5[%c0_20, %c0_21, %c0_22, %c0_23], %22 {strides = array<i32>} : memref<1x2x8x128xf32, #tpu.memory_space<vmem>>, vector<1x2x8x128xf32>,
    %c0_24 = arith.constant 0 : index
    %c0_25 = arith.constant 0 : index
    %c0_26 = arith.constant 0 : index
    %c0_27 = arith.constant 0 : index
    %24 = vector.load %arg6[%c0_24, %c0_25, %c0_26, %c0_27] : memref<1x2x8x128xf32, #tpu.memory_space<vmem>>, vector<1x2x8x128xf32>
    %cst_28 = arith.constant dense<0.000000e+00> : vector<2x8x128xf32>
    %25 = vector.multi_reduction <add>, %11, %cst_28 [1] : vector<2x1x8x128xf32> to vector<2x8x128xf32>
    %26 = vector.shape_cast %25 : vector<2x8x128xf32> to vector<1x2x8x128xf32>
    %27 = arith.addf %24, %26 : vector<1x2x8x128xf32>
    %c0_29 = arith.constant 0 : index
    %c0_30 = arith.constant 0 : index
    %c0_31 = arith.constant 0 : index
    %c0_32 = arith.constant 0 : index
    %28 = vector.load %arg6[%c0_29, %c0_30, %c0_31, %c0_32] : memref<1x2x8x128xf32, #tpu.memory_space<vmem>>, vector<1x2x8x128xf32>
    tpu.vector_store %arg6[%c0_29, %c0_30, %c0_31, %c0_32], %27 {strides = array<i32>} : memref<1x2x8x128xf32, #tpu.memory_space<vmem>>, vector<1x2x8x128xf32>,
    return
  }
  func.func @transform_0(%arg0: i32, %arg1: i32) -> (i32, i32, i32) {
    %c1_i32 = arith.constant 1 : i32
    %0 = arith.muli %arg0, %c1_i32 : i32
    %1 = arith.addi %0, %arg1 : i32
    %c0_i32 = arith.constant 0 : i32
    %2 = arith.minsi %1, %c0_i32 : i32
    %c0_i32_0 = arith.constant 0 : i32
    %c0_i32_1 = arith.constant 0 : i32
    %c0_i32_2 = arith.constant 0 : i32
    return %c0_i32_0, %2, %c0_i32_1 : i32, i32, i32
  }
  func.func @transform_1(%arg0: i32, %arg1: i32) -> (i32, i32, i32) {
    %c1_i32 = arith.constant 1 : i32
    %0 = arith.muli %arg0, %c1_i32 : i32
    %1 = arith.addi %0, %arg1 : i32
    %c0_i32 = arith.constant 0 : i32
    %2 = arith.minsi %1, %c0_i32 : i32
    %c0_i32_0 = arith.constant 0 : i32
    %c0_i32_1 = arith.constant 0 : i32
    %c0_i32_2 = arith.constant 0 : i32
    return %c0_i32_0, %2, %c0_i32_1 : i32, i32, i32
  }
  func.func @transform_2(%arg0: i32, %arg1: i32) -> (i32, i32, i32, i32) {
    %c0_i32 = arith.constant 0 : i32
    %c0_i32_0 = arith.constant 0 : i32
    %c0_i32_1 = arith.constant 0 : i32
    %c0_i32_2 = arith.constant 0 : i32
    return %arg0, %c0_i32, %c0_i32_0, %c0_i32_1 : i32, i32, i32, i32
  }
  func.func @transform_3(%arg0: i32, %arg1: i32) -> (i32, i32, i32, i32) {
    %c0_i32 = arith.constant 0 : i32
    %c0_i32_0 = arith.constant 0 : i32
    %c0_i32_1 = arith.constant 0 : i32
    %c0_i32_2 = arith.constant 0 : i32
    return %arg0, %c0_i32, %c0_i32_0, %c0_i32_1 : i32, i32, i32, i32
  }
  func.func @transform_4(%arg0: i32, %arg1: i32) -> (i32, i32, i32, i32) {
    %c0_i32 = arith.constant 0 : i32
    %c0_i32_0 = arith.constant 0 : i32
    %c0_i32_1 = arith.constant 0 : i32
    %c0_i32_2 = arith.constant 0 : i32
    return %arg0, %c0_i32, %c0_i32_0, %c0_i32_1 : i32, i32, i32, i32
  }
}

</mosaic_0001>

<bundles_post_ra>
// kernel: tpu_custom_call.1
= control target key start
LH: loop header
LB: loop body
LE: loop exit
PB: predicated region body
PF: predicated region fallthrough
CT: control target
= control target key end

     0   :  { %10 = vsyncpa [#allocation3], 0  ;;  %s362_s0 = inlined_call_operand.hbm [shape: f32[2,8,128], index: 0, kind: input, shape index: {}]   ;;  %s363_s1 = inlined_call_operand.hbm [shape: f32[2,8,128], index: 1, kind: input, shape index: {}]   ;;  %s364_s2 = inlined_call_operand.hbm [shape: f32[1,2,8,128], index: 2, kind: output, shape index: {0}]   ;;  %s365_s3 = inlined_call_operand.hbm [shape: f32[1,2,8,128], index: 3, kind: output, shape index: {1}]   ;;  %s366_s4 = inlined_call_operand.hbm [shape: f32[1,2,8,128], index: 4, kind: output, shape index: {2}]  }
   0x1   :  { %11 = vsyncpa [#allocation6], 0 }
   0x2   :  { %12 = vsyncpa [#allocation4], 0 }
   0x3   :  { %13 = vsyncpa [#allocation9], 0  ;;  %s293_s15 = smov [#allocation2]  }
   0x4   :  { %s24_s16 = sshll.u32 %s293_s15, 4  ;;  %s25_s16 = int_to_ptr.vmem [resolvable:$true] %s24_s16 }
   0x5   :  { %s193_s17 = scalar_lea.vmem %s25_s16, 256  ;;  %p198_p1 = scmp.lt.s32.totalorder %s25_s16, %s25_s16 }
   0x6   :  { %p194_p0 = scmp.ne.s32.totalorder %s25_s16, %s193_s17  ;;  %p199_p2 = scmp.lt.s32.totalorder %s193_s17, %s193_s17 }
   0x8   :  { %p200_p3 = por %p199_p2, %p198_p1 }
   0xa   :  { %p201_p4 = pnand %p200_p3, %p194_p0 }
   0xc   :  { %204 = shalt.err (!%p201_p4)
}
   0xd   :  { %s294_s18 = smov 128   ;;  %s295_s19 = smov 8  }
   0xe   :  { %30 = dma.hbm_to_vmem [thread:$0]  %s362_s0, 256, %s25_s16, [#allocation3], %s294_s18, %s294_s18, %s295_s19  }
   0xf   :  { %s296_s22 = smov [#allocation5]  }
  0x10   :  { %s41_s23 = sshll.u32 %s296_s22, 4  ;;  %s42_s23 = int_to_ptr.vmem [resolvable:$true] %s41_s23 }
  0x11   :  { %s213_s24 = scalar_lea.vmem %s42_s23, 256  ;;  %p218_p6 = scmp.lt.s32.totalorder %s42_s23, %s42_s23 }
  0x12   :  { %p214_p5 = scmp.ne.s32.totalorder %s42_s23, %s213_s24  ;;  %p219_p7 = scmp.lt.s32.totalorder %s213_s24, %s213_s24 }
  0x14   :  { %p220_p8 = por %p219_p7, %p218_p6 }
  0x16   :  { %p221_p9 = pnand %p220_p8, %p214_p5 }
  0x18   :  { %224 = shalt.err (!%p221_p9)
}
  0x19   :  { %47 = dma.hbm_to_vmem [thread:$0]  %s363_s1, 256, %s42_s23, [#allocation6], %s294_s18, %s294_s18, %s295_s19  }
  0x1a   :  { %285 = dma.done.wait [#allocation3], 256  }
  0x1b   :  { %286 = vsyncadd [#allocation3], 4294967040 }
  0x1c   :  { %287 = dma.done.wait [#allocation6], 256  }
  0x1d   :  { %288 = vsyncadd [#allocation6], 4294967040  ;;  %v70_v0 = vld [vmem:[#allocation2] sm:$0xff]  ;;  %v71_v1 = vld [vmem:[#allocation2 + $0x8] sm:$0xff]  ;;  %s297_s0 = smov [#allocation8]   ;;  %s298_s27 = smov [#allocation10]  }
  0x1e   :  { %v84_v2 = vld [vmem:[#allocation5] sm:$0xff]  ;;  %v167_v3 = vmul.f32 -1.442695, %v70_v0  ;;  %v168_v4 = vmul.f32 -1.442695, %v71_v1  ;;  %v85_v5 = vld [vmem:[#allocation5 + $0x8] sm:$0xff] }
  0x1f   :  { %112 = vst [vmem:[#allocation10] sm:$0xff] %v84_v2  ;;  %113 = vst [vmem:[#allocation10 + $0x8] sm:$0xff] %v85_v5  ;;  %s131_s1 = sshll.u32 %s297_s0, 4  ;;  %s143_s28 = sshll.u32 %s298_s27, 4  ;;  %s132_s1 = int_to_ptr.vmem [resolvable:$true] %s131_s1  ;;  %s144_s28 = int_to_ptr.vmem [resolvable:$true] %s143_s28 }
  0x20   :  { %177 = vpow2.f32 %v167_v3  ;;  %s299_s29 = smov [#allocation7]   ;;  %s225_s5 = scalar_lea.vmem %s132_s1, 256 }
  0x21   :  { %179 = vpow2.f32 %v168_v4  ;;  %s119_s30 = sshll.u32 %s299_s29, 4  ;;  %p226_p10 = scmp.ne.s32.totalorder %s132_s1, %s225_s5  ;;  %s337_s30 = int_to_ptr.vmem [resolvable:$true] %s119_s30 }
  0x22   :  { %p230_p11 = scmp.lt.s32.totalorder %s132_s1, %s132_s1  ;;  %p231_p12 = scmp.lt.s32.totalorder %s225_s5, %s225_s5 }
  0x24   :  { %p232_p13 = por %p231_p12, %p230_p11 }
  0x26   :  { %p233_p0 = pnand %p232_p13, %p226_p10 }
  0x2d   :  { %v178_v6 = vpop.eup %177 }
  0x2e   :  { %v180_v7 = vpop.eup %179  ;;  %v78_v8 = vadd.f32 1.0, %v178_v6 }
  0x2f   :  { %v79_v9 = vadd.f32 1.0, %v180_v7 }
  0x30   :  { %181 = vrcp.f32 %v78_v8 }
  0x31   :  { %183 = vrcp.f32 %v79_v9 }
  0x3d   :  { %v182_v10 = vpop.eup %181 }
  0x3e   :  { %v184_v11 = vpop.eup %183  ;;  %v88_v12 = vmul.f32 %v182_v10, %v84_v2  ;;  %104 = vst [vmem:[#allocation8] sm:$0xff] %v182_v10 }
  0x3f   :  { %v89_v13 = vmul.f32 %v184_v11, %v85_v5  ;;  %105 = vst [vmem:[#allocation8 + $0x8] sm:$0xff] %v184_v11 }
  0x40   :  { %v90_v14 = vand.u32 2147483647, %v88_v12 }
  0x41   :  { %v91_v15 = vand.u32 2147483647, %v89_v13 }
  0x42   :  { %236 = shalt.err (!%p233_p0)
}
  0x43   :  { %137 = dma.vmem_to_hbm [thread:$0]  %s132_s1, 256, %s365_s3, [#allocation9], %s294_s18, %s294_s18, %s295_s19  }
  0x44   :  { %s245_s8 = scalar_lea.vmem %s144_s28, 256  ;;  %p250_p2 = scmp.lt.s32.totalorder %s144_s28, %s144_s28 }
  0x45   :  { %p246_p1 = scmp.ne.s32.totalorder %s144_s28, %s245_s8  ;;  %p251_p3 = scmp.lt.s32.totalorder %s245_s8, %s245_s8 }
  0x47   :  { %p252_p4 = por %p251_p3, %p250_p2 }
  0x49   :  { %p253_p5 = pnand %p252_p4, %p246_p1 }
  0x4b   :  { %256 = shalt.err (!%p253_p5)
}
  0x4c   :  { %149 = dma.vmem_to_hbm [thread:$0]  %s144_s28, 256, %s366_s4, [#allocation9], %s294_s18, %s294_s18, %s295_s19   ;;  %96 = vst [vmem:[#allocation7] sm:$0xff] %v90_v14  ;;  %97 = vst [vmem:[#allocation7 + $0x8] sm:$0xff] %v91_v15 }
  0x4d   :  { %s265_s3 = scalar_lea.vmem %s337_s30, 256  ;;  %p270_p7 = scmp.lt.s32.totalorder %s337_s30, %s337_s30 }
  0x4e   :  { %p266_p6 = scmp.ne.s32.totalorder %s337_s30, %s265_s3  ;;  %p271_p8 = scmp.lt.s32.totalorder %s265_s3, %s265_s3 }
  0x50   :  { %p272_p9 = por %p271_p8, %p270_p7 }
  0x52   :  { %p273_p10 = pnand %p272_p9, %p266_p6 }
  0x54   :  { %276 = shalt.err (!%p273_p10)
}
  0x55   :  { %125 = dma.vmem_to_hbm [thread:$0]  %s337_s30, 256, %s364_s2, [#allocation4], %s294_s18, %s294_s18, %s295_s19  }
  0x56   :  { %289 = dma.done.wait [#allocation4], 256  }
  0x57   :  { %290 = vsyncadd [#allocation4], 4294967040 }
  0x58   :  { %291 = dma.done.wait [#allocation9], 512  }
  0x59   :  { %292 = vsyncadd [#allocation9], 4294966784 }
  0x5a   :  { %159 = vsyncpa [#allocation3], 1 }
  0x5b   :  { %160 = vsyncpa [#allocation6], 1 }
  0x5c   :  { %161 = vsyncpa [#allocation4], 1 }
  0x5d   :  { %162 = vsyncpa [#allocation9], 1 }

</bundles_post_ra>
